<compile_context>
chip_gen: v6e
topology: v6e:2x2x1
jax: 0.10.0
libtpu: 0.0.40
codegen_flags: <defaults>
</compile_context>

<pallas_src>
import numpy as np
import jax
import jax.numpy as jnp
from jax.experimental import pallas as pl
from jax.experimental.pallas import tpu as pltpu


# ----------------------------------------------------------------------------
# Fused SE kernel: one batch chunk (Nb, HW, C) per grid step.
# ----------------------------------------------------------------------------
def _se_kernel(x_ref, w1_ref, b1_ref, w2_ref, b2_ref, o_ref):
    x = x_ref[...]                                            # (Nb, HW, C)

    # Squeeze: spatial sum in f32 (the 1/(H*W) normalization is folded into w1).
    s = jnp.sum(x.astype(jnp.float32), axis=1)                # (Nb, C)

    # Excite: FC -> ReLU -> FC -> Sigmoid, batched over Nb rows (MXU, f32 acc).
    y = jnp.dot(s, w1_ref[...], preferred_element_type=jnp.float32) + b1_ref[...]
    y = jnp.maximum(y, 0.0)
    y = jnp.dot(y, w2_ref[...], preferred_element_type=jnp.float32) + b2_ref[...]
    gate = jax.nn.sigmoid(y).astype(x.dtype)                  # (Nb, C)

    # Scale: per-channel gate broadcast over spatial rows; lane-dense store
    # (C is a multiple of 128 in this config).
    o_ref[...] = x * gate[:, None, :]


def se_module(x, w1, b1, w2, b2):
    """Pallas SE forward.  x: (N, H, W, C); w1: (C, Cse); w2: (Cse, C)."""
    N, H, W, C = x.shape
    HW = H * W
    Cse = w1.shape[1]
    itemsize = jnp.dtype(x.dtype).itemsize

    # Free metadata reshape on the HBM array (no in-kernel reshape needed).
    x2 = x.reshape(N, HW, C)

    # Fold the pooling normalization into w1 once.
    w1n = (w1.astype(jnp.float32) * (1.0 / HW)).astype(w1.dtype)

    # Batch elements per grid step: as few steps as possible (amortize the
    # ~0.35 us/step overhead on single-TC v5e/v6e), but keep >= 2 steps when
    # N >= 2 so both v7x TensorCores get work, and cap the per-step footprint
    # (in + out, double-buffered) well under v7x's 64 MiB physical VMEM.
    per_elem_bytes = 4 * HW * C * itemsize          # in + out, double-buffered
    budget_bytes = 16 << 20
    nb_cap = max(1, budget_bytes // per_elem_bytes)
    nb = int(min(nb_cap, max(1, pl.cdiv(N, 2))))
    grid_n = int(pl.cdiv(N, nb))

    # Scoped-VMEM guard (v5e scoped default 16 MiB; v7x physical only 64 MiB).
    weight_bytes = (C * Cse + Cse + Cse * C + C) * 4
    needed = per_elem_bytes * nb + weight_bytes + (2 << 20)
    vmem_limit = int(min(max(2 * needed, 32 << 20), 48 << 20))

    cost = pl.CostEstimate(
        flops=4 * N * C * Cse + 2 * N * HW * C,
        transcendentals=N * C,
        bytes_accessed=2 * N * HW * C * itemsize + weight_bytes,
    )

    out2 = pl.pallas_call(
        _se_kernel,
        out_shape=jax.ShapeDtypeStruct((N, HW, C), x.dtype),
        grid=(grid_n,),
        in_specs=[
            pl.BlockSpec((nb, HW, C), lambda n: (n, 0, 0)),   # per-step batch chunk
            pl.BlockSpec((C, Cse), lambda n: (0, 0)),         # resident weight
            pl.BlockSpec((1, Cse), lambda n: (0, 0)),         # resident bias
            pl.BlockSpec((Cse, C), lambda n: (0, 0)),         # resident weight
            pl.BlockSpec((1, C), lambda n: (0, 0)),           # resident bias
        ],
        out_specs=pl.BlockSpec((nb, HW, C), lambda n: (n, 0, 0)),
        compiler_params=pltpu.CompilerParams(
            dimension_semantics=("parallel",),
            vmem_limit_bytes=vmem_limit),
        cost_estimate=cost,
    )(x2, w1n, b1.reshape(1, Cse), w2, b2.reshape(1, C))

    return out2.reshape(N, H, W, C)


# ----------------------------------------------------------------------------
# Pure-JAX reference (channels-last) for validation.
# ----------------------------------------------------------------------------
def se_ref(x, w1, b1, w2, b2):
    m = jnp.mean(x, axis=(1, 2), keepdims=True)                    # (N,1,1,C)
    y = jax.nn.relu(jnp.einsum("nijc,cs->nijs", m, w1) + b1)
    g = jax.nn.sigmoid(jnp.einsum("nijs,sc->nijc", y, w2) + b2)
    return x * g


# ----------------------------------------------------------------------------
if __name__ == "__main__":
    # Small but TPU-friendly config: C = 128 keeps all stores lane-dense,
    # Cse = C // 4 is the usual SE reduction.
    N, H, W, C = 2, 16, 16, 128
    Cse = C // 4

    key = jax.random.PRNGKey(0)
    kx, k1, k2, k3, k4 = jax.random.split(key, 5)
    x = jax.random.normal(kx, (N, H, W, C), dtype=jnp.float32)     # NHWC
    w1 = (0.1 * jax.random.normal(k1, (C, Cse))).astype(jnp.float32)
    b1 = (0.1 * jax.random.normal(k2, (Cse,))).astype(jnp.float32)
    w2 = (0.1 * jax.random.normal(k3, (Cse, C))).astype(jnp.float32)
    b2 = (0.1 * jax.random.normal(k4, (C,))).astype(jnp.float32)

    out = jax.block_until_ready(se_module(x, w1, b1, w2, b2))
    ref = jax.block_until_ready(se_ref(x, w1, b1, w2, b2))

    err = float(np.max(np.abs(np.asarray(out) - np.asarray(ref))))
    if not np.allclose(np.asarray(out), np.asarray(ref), atol=1e-3, rtol=1e-3):
        raise AssertionError("SEModule Pallas mismatch, max abs err = %e" % err)
    print("KERNEL_OK")
</pallas_src>

<mosaic_0001>
module attributes {stable_mosaic.version = 11 : i64} {
  func.func @_se_kernel(%arg0: i32, %arg1: memref<1x256x128xf32, #tpu.memory_space<vmem>>, %arg2: memref<128x32xf32, #tpu.memory_space<vmem>>, %arg3: memref<1x32xf32, #tpu.memory_space<vmem>>, %arg4: memref<32x128xf32, #tpu.memory_space<vmem>>, %arg5: memref<1x128xf32, #tpu.memory_space<vmem>>, %arg6: memref<1x256x128xf32, #tpu.memory_space<vmem>>) attributes {dimension_semantics = [#tpu.dimension_semantics<parallel>], iteration_bounds = array<i64: 2>, scalar_prefetch = 0 : i64, scratch_operands = 0 : i64, tpu.core_type = #tpu.core_type<tc>, window_params = [{transform_indices = @transform_0, window_bounds = array<i64: 1, 256, 128>}, {pipeline_mode = #tpu.pipeline_mode<synchronous>, transform_indices = @transform_1, window_bounds = array<i64: 128, 32>}, {pipeline_mode = #tpu.pipeline_mode<synchronous>, transform_indices = @transform_2, window_bounds = array<i64: 1, 32>}, {pipeline_mode = #tpu.pipeline_mode<synchronous>, transform_indices = @transform_3, window_bounds = array<i64: 32, 128>}, {pipeline_mode = #tpu.pipeline_mode<synchronous>, transform_indices = @transform_4, window_bounds = array<i64: 1, 128>}, {transform_indices = @transform_5, window_bounds = array<i64: 1, 256, 128>}]} {
    %c0 = arith.constant 0 : index
    %c0_0 = arith.constant 0 : index
    %c0_1 = arith.constant 0 : index
    %0 = vector.load %arg1[%c0, %c0_0, %c0_1] : memref<1x256x128xf32, #tpu.memory_space<vmem>>, vector<1x256x128xf32>
    %cst = arith.constant dense<0.000000e+00> : vector<1x128xf32>
    %1 = vector.multi_reduction <add>, %0, %cst [1] : vector<1x256x128xf32> to vector<1x128xf32>
    %c0_2 = arith.constant 0 : index
    %c0_3 = arith.constant 0 : index
    %2 = vector.load %arg2[%c0_2, %c0_3] : memref<128x32xf32, #tpu.memory_space<vmem>>, vector<128x32xf32>
    %cst_4 = arith.constant dense<0.000000e+00> : vector<1x32xf32>
    %3 = tpu.matmul %1, %2, %cst_4 {dimension_numbers = #tpu.dot_dimension_numbers<[1], [0], [0], [1], [0, 0, 1, 1], [], []>} : vector<1x128xf32>, vector<128x32xf32>, vector<1x32xf32> -> vector<1x32xf32>
    %c0_5 = arith.constant 0 : index
    %c0_6 = arith.constant 0 : index
    %4 = vector.load %arg3[%c0_5, %c0_6] : memref<1x32xf32, #tpu.memory_space<vmem>>, vector<1x32xf32>
    %5 = arith.addf %3, %4 : vector<1x32xf32>
    %cst_7 = arith.constant 0.000000e+00 : f32
    %6 = vector.broadcast %cst_7 : f32 to vector<1x32xf32>
    %7 = arith.maximumf %5, %6 : vector<1x32xf32>
    %c0_8 = arith.constant 0 : index
    %c0_9 = arith.constant 0 : index
    %8 = vector.load %arg4[%c0_8, %c0_9] : memref<32x128xf32, #tpu.memory_space<vmem>>, vector<32x128xf32>
    %cst_10 = arith.constant dense<0.000000e+00> : vector<1x128xf32>
    %9 = tpu.matmul %7, %8, %cst_10 {dimension_numbers = #tpu.dot_dimension_numbers<[1], [0], [0], [1], [0, 0, 1, 1], [], []>} : vector<1x32xf32>, vector<32x128xf32>, vector<1x128xf32> -> vector<1x128xf32>
    %c0_11 = arith.constant 0 : index
    %c0_12 = arith.constant 0 : index
    %10 = vector.load %arg5[%c0_11, %c0_12] : memref<1x128xf32, #tpu.memory_space<vmem>>, vector<1x128xf32>
    %11 = arith.addf %9, %10 : vector<1x128xf32>
    %12 = arith.negf %11 : vector<1x128xf32>
    %13 = math.exp %12 : vector<1x128xf32>
    %cst_13 = arith.constant 1.000000e+00 : f32
    %14 = vector.broadcast %cst_13 : f32 to vector<1x128xf32>
    %15 = arith.addf %14, %13 : vector<1x128xf32>
    %16 = arith.divf %14, %15 : vector<1x128xf32>
    %17 = vector.shape_cast %16 : vector<1x128xf32> to vector<1x1x128xf32>
    %18 = vector.broadcast %17 : vector<1x1x128xf32> to vector<1x256x128xf32>
    %19 = arith.mulf %0, %18 : vector<1x256x128xf32>
    %c0_14 = arith.constant 0 : index
    %c0_15 = arith.constant 0 : index
    %c0_16 = arith.constant 0 : index
    %20 = vector.load %arg6[%c0_14, %c0_15, %c0_16] : memref<1x256x128xf32, #tpu.memory_space<vmem>>, vector<1x256x128xf32>
    tpu.vector_store %arg6[%c0_14, %c0_15, %c0_16], %19 {strides = array<i32>} : memref<1x256x128xf32, #tpu.memory_space<vmem>>, vector<1x256x128xf32>,
    return
  }
  func.func @transform_0(%arg0: i32) -> (i32, i32, i32) {
    %c0_i32 = arith.constant 0 : i32
    %c0_i32_0 = arith.constant 0 : i32
    %c0_i32_1 = arith.constant 0 : i32
    return %arg0, %c0_i32, %c0_i32_0 : i32, i32, i32
  }
  func.func @transform_1(%arg0: i32) -> (i32, i32) {
    %c0_i32 = arith.constant 0 : i32
    %c0_i32_0 = arith.constant 0 : i32
    %c0_i32_1 = arith.constant 0 : i32
    return %c0_i32, %c0_i32_0 : i32, i32
  }
  func.func @transform_2(%arg0: i32) -> (i32, i32) {
    %c0_i32 = arith.constant 0 : i32
    %c0_i32_0 = arith.constant 0 : i32
    %c0_i32_1 = arith.constant 0 : i32
    return %c0_i32, %c0_i32_0 : i32, i32
  }
  func.func @transform_3(%arg0: i32) -> (i32, i32) {
    %c0_i32 = arith.constant 0 : i32
    %c0_i32_0 = arith.constant 0 : i32
    %c0_i32_1 = arith.constant 0 : i32
    return %c0_i32, %c0_i32_0 : i32, i32
  }
  func.func @transform_4(%arg0: i32) -> (i32, i32) {
    %c0_i32 = arith.constant 0 : i32
    %c0_i32_0 = arith.constant 0 : i32
    %c0_i32_1 = arith.constant 0 : i32
    return %c0_i32, %c0_i32_0 : i32, i32
  }
  func.func @transform_5(%arg0: i32) -> (i32, i32, i32) {
    %c0_i32 = arith.constant 0 : i32
    %c0_i32_0 = arith.constant 0 : i32
    %c0_i32_1 = arith.constant 0 : i32
    return %arg0, %c0_i32, %c0_i32_0 : i32, i32, i32
  }
}

</mosaic_0001>

<bundles_post_ra>
// kernel: tpu_custom_call.1
= control target key start
LH: loop header
LB: loop body
LE: loop exit
PB: predicated region body
PF: predicated region fallthrough
CT: control target
= control target key end

     0   :  { %10 = vsyncpa [#allocation3], 0  ;;  %s1357_s0 = inlined_call_operand.hbm [shape: f32[2,256,128], index: 0, kind: input, shape index: {}]   ;;  %s1358_s1 = inlined_call_operand.vmem [shape: f32[128,32], index: 1, kind: input, shape index: {}]   ;;  %s1359_s2 = inlined_call_operand.vmem [shape: f32[1,32], index: 2, kind: input, shape index: {}]   ;;  %s1360_s3 = inlined_call_operand.vmem [shape: f32[32,128], index: 3, kind: input, shape index: {}]   ;;  %s1361_s4 = inlined_call_operand.vmem [shape: f32[1,128], index: 4, kind: input, shape index: {}]   ;;  %s1362_s5 = inlined_call_operand.hbm [shape: f32[2,256,128], index: 5, kind: output, shape index: {}]  }
   0x1   :  { %12 = vsyncpa [#allocation3 + $0x1], 0 }
   0x2   :  { %13 = vsyncpa [#allocation4], 0 }
   0x3   :  { %15 = vsyncpa [#allocation4 + $0x1], 0  ;;  %s914_s18 = smov 0   ;;  %s916_s19 = smov 0  }
   0x4   :  { %s918_s20 = smov 0   ;;  %s920_s21 = smov 0  }
   0x5 LB: > { %s935_s22 = sadd.s32 4294967295, %s874_s21   ;;  %s640_s23 = sadd.s32 4294967294, %s874_s21   ;;  %s874_s21 = sphi %s920_s21, %s1377_s21   ;;  %s870_s20 = sphi %s918_s20, %s1376_s20   ;;  %s866_s19 = sphi %s916_s19, %s1375_s19   ;;  %s862_s18 = sphi %s914_s18, %s1374_s18  }
   0x6   : > { %s939_s24 = sadd.s32 1, %s874_s21   ;;  %s28_s25 = sadd.s32 1, %s870_s20 }
   0x7   : > { %s25_s26 = ssub.s32 %s874_s21, %s939_s24  ;;  %p35_p0 = scmp.ne.s32.totalorder %s870_s20, %s866_s19 }
   0x8   : > { %p26_p1 = scmp.eq.s32.totalorder %s25_s26, 0  ;;  %p36_p2 = scmp.eq.s32.totalorder %s874_s21, 0 }
   0x9   : > { %p41_p3 = scmp.ne.s32.totalorder %s866_s19, %s862_s18  ;;  %p42_p4 = scmp.eq.s32.totalorder %s935_s22, 0 }
   0xa   : > { %s951_s27 = scalar_select %p26_p1, %s870_s20, %s28_s25  }
   0xb   : > { %p953_p5 = por %p36_p2, %p35_p0  ;;  %p957_p6 = por %p42_p4, %p41_p3 }
   0xc   : > { %p149_p7 = scmp.eq.s32.totalorder %s935_s22, 1  ;;  %p155_p8 = scmp.eq.s32.totalorder %s640_s23, 1 }
   0xd   : > { %s1366_s29 = scalar_select %p957_p6, 1, 0 }
   0xe   : > { %p738_p10 = scmp.lt.s32.totalorder %s874_s21, 2  ;;  %p964_p11 = por %p149_p7, %p35_p0 }
   0xf   : > { %p968_p12 = por %p155_p8, %p41_p3  ;;  %s187_s7 = sand.u32 1, %s870_s20  }
  0x10   : > { %s1367_s30 = scalar_select %p964_p11, 1, 0 }
  0x11   : > { %s1368_s6 = scalar_select %p968_p12, 1, 0 }
  0x12   : > { %s656_s8 = sshll.u32 %s874_s21, 12  ;;  %s643_s9 = sshll.u32 %s187_s7, 8 }
  0x13   : > { %s977_s12 = scalar_lea.hbm %s1357_s0, %s656_s8  ;;  %s191_s13 = scalar_lea.vmem [#allocation2], %s643_s9 }
  0x14   : > { %s198_s14 = sshll.u32 %s191_s13, 4  ;;  %p981_p13 = pnand %p738_p10, %p953_p5  ;;  %s985_s14 = int_to_ptr.vmem [resolvable:$true] %s198_s14 }
  0x15   : > { %s987_s16 = scalar_lea.sflag [#allocation3], %s187_s7  ;;  %s782_s17 = scalar_lea.hbm %s977_s12, 4096 }
  0x16   : > { %p783_p0 = scmp.ne.s32.totalorder %s977_s12, %s782_s17  ;;  %p784_p1 = pneg %p981_p13 }
  0x17   : > { %s787_s26 = scalar_lea.hbm %s1357_s0, 8192  ;;  %p788_p4 = scmp.lt.s32.totalorder %s977_s12, %s1357_s0 }
  0x18   : > { %p785_p2 = pnand %p784_p1, %p783_p0  ;;  %p789_p5 = scmp.lt.s32.totalorder %s787_s26, %s782_s17 }
  0x1a   : > { %p786_p3 = pneg %p785_p2  ;;  %p790_p7 = por %p789_p5, %p788_p4 }
  0x1c   : > { %p791_p8 = pnand %p790_p7, %p786_p3 }
  0x1e   : > { %794 = shalt.err (!%p791_p8)
}
  0x1f   : > { %s795_s7 = scalar_lea.vmem %s985_s14, 4096  ;;  %s876_s9 = smov [#allocation2]  }
  0x20   : > { %p796_p10 = scmp.ne.s32.totalorder %s985_s14, %s795_s7  ;;  %s800_s10 = sshll.u32 %s876_s9, 4  ;;  %s801_s10 = int_to_ptr.vmem [resolvable:$false] %s800_s10 }
  0x21   : > { %s802_s11 = scalar_lea.vmem %s801_s10, 8192  ;;  %p803_p2 = scmp.lt.s32.totalorder %s985_s14, %s801_s10 }
  0x22   : > { %p798_p9 = pnand %p796_p10, %p784_p1  ;;  %p804_p12 = scmp.lt.s32.totalorder %s802_s11, %s795_s7 }
  0x24   : > { %p799_p0 = pneg %p798_p9  ;;  %p805_p11 = por %p804_p12, %p803_p2 }
  0x26   : > { %p806_p6 = pnand %p805_p11, %p799_p0 }
  0x28   : > { %809 = shalt.err (!%p806_p6)
}
  0x29   : > { %s877_s13 = smov 128   ;;  %s878_s17 = smov 8  }
  0x2a   : > { %733 = dma.hbm_to_vmem [thread:$0]  (!%p981_p13), %s977_s12, 4096, %s985_s14, %s987_s16, %s877_s13, %s877_s13, %s878_s17  }
  0x2b   : > { %p646_p9 = scmp.ge.s32.totalorder %s874_s21, 1  ;;  %p206_p1 = scmp.lt.s32.totalorder %s874_s21, 3 }
  0x2d   : > { %p207_p3 = pnand %p646_p9, %p206_p1 }
  0x2e   : > { %s1011_s23 = sand.u32 (!%p207_p3), 1, %s866_s19   ;;  %p1370_p6 = scmp.ne.s32.totalorder (!%p207_p3), %s1366_s29, 0 }
  0x2f   : > { %210 = sbr.rel (%p207_p3) target bundleno = 588 (0x24c), region = 40  ;;  %s647_s25 = sshll.u32 (!%p207_p3), %s1011_s23, 8 }
  0x30   : > { %s213_s26 = scalar_lea.sflag (!%p207_p3), [#allocation3], %s1011_s23  ;;  %s1017_s28 = scalar_lea.vmem (!%p207_p3), [#allocation2], %s647_s25 }
  0x34   : > { %853 = dma.done.wait (%p1370_p6), %s213_s26, 4096  }
  0x35   : > { %855 = vsyncadd (%p1370_p6), %s213_s26, 4294963200  ;;  %v879_v0 = vmov 0.0   ;;  %vm880_vm0 = vmmov 0   ;;  %v327_v1 = vld [vmem:[%s1358_s1 + $0x78] sm:$0xff]  ;;  %v326_v2 = vld [vmem:[%s1358_s1 + $0x70] sm:$0xff]  ;;  %vm405_vm1 = vcmask 261120  }
  0x36   : > { %680 = vmatprep.subr.mxu0 %v879_v0  ;;  %712 = vmatprep.mubr.msk.f32.mxu0 %vm880_vm0, %v879_v0  ;;  %v325_v3 = vld [vmem:[%s1358_s1 + $0x68] sm:$0xff]  ;;  %v324_v4 = vld [vmem:[%s1358_s1 + $0x60] sm:$0xff]  ;;  %v323_v7 = vld [vmem:[%s1358_s1 + $0x58] sm:$0xff]  ;;  %s1253_s16 = scalar_lea.vmem [#allocation5], %s647_s25  ;;  %s657_s25 = sshll.u32 %s935_s22, 12 }
  0x37   : > { %715 = vmatprep.subr.mxu1 %v879_v0  ;;  %723 = vmatprep.mubr.msk.f32.mxu1 %vm880_vm0, %v879_v0  ;;  %v1042_v5 = vld [vmem:[%s1017_s28] sm:$0xff]  ;;  %v1045_v6 = vld [vmem:[%s1017_s28 + $0x8] sm:$0xff]  ;;  %v1052_v8 = vld [vmem:[%s1017_s28 + $0x10] sm:$0xff]  ;;  %s567_s8 = sshll.u32 %s1253_s16, 4  ;;  %s1296_s9 = scalar_lea.hbm %s1362_s5, %s657_s25  ;;  %s1298_s8 = int_to_ptr.vmem [resolvable:$true] %s567_s8 }
  0x38   : > { %681 = vmatpush3.msra.mxu0 %v327_v1  ;;  %v275_v9 = vadd.f32 %v1045_v6, %v1042_v5  ;;  %v1057_v10 = vld [vmem:[%s1017_s28 + $0x18] sm:$0xff]  ;;  %v322_v11 = vld [vmem:[%s1358_s1 + $0x50] sm:$0xff]  ;;  %v1065_v13 = vld [vmem:[%s1017_s28 + $0x20] sm:$0xff]  ;;  %s554_s10 = scalar_lea.sflag [#allocation4], %s1011_s23  ;;  %s810_s11 = scalar_lea.vmem %s1298_s8, 4096 }
  0x39   : > { %682 = vmatprep.subr.mxu0 %v879_v0  ;;  %v321_v14 = vld [vmem:[%s1358_s1 + $0x48] sm:$0xff]  ;;  %v320_v17 = vld [vmem:[%s1358_s1 + $0x40] sm:$0xff]  ;;  %v1081_v19 = vld [vmem:[%s1017_s28 + $0x30] sm:$0xff]  ;;  %p811_p11 = scmp.ne.s32.totalorder %s1298_s8, %s810_s11  ;;  %p1371_p12 = scmp.ne.s32.totalorder %s1367_s30, 0 }
  0x3a   : > { %683 = vmatpush3.msra.mxu0 %v326_v2  ;;  %v276_v12 = vadd.f32 %v275_v9, %v1052_v8  ;;  %v1073_v16 = vld [vmem:[%s1017_s28 + $0x28] sm:$0xff]  ;;  %v319_v20 = vld [vmem:[%s1358_s1 + $0x38] sm:$0xff]  ;;  %v318_v23 = vld [vmem:[%s1358_s1 + $0x30] sm:$0xff] }
  0x3b   : > { %684 = vmatprep.subr.mxu0 %v879_v0  ;;  %v1089_v22 = vld [vmem:[%s1017_s28 + $0x38] sm:$0xff]  ;;  %v1100_v26 = vld [vmem:[%s1017_s28 + $0x40] sm:$0xff]  ;;  %v317_v27 = vld [vmem:[%s1358_s1 + $0x28] sm:$0xff]  ;;  %p812_p13 = pnand %p811_p11, %p1371_p12 }
  0x3c   : > { %685 = vmatpush3.msra.mxu0 %v325_v3  ;;  %v277_v15 = vadd.f32 %v276_v12, %v1057_v10  ;;  %v403_v25 = vld [vmem:[%s1360_s3 + $0x18] sm:$0xff]  ;;  %v1109_v29 = vld [vmem:[%s1017_s28 + $0x48] sm:$0xff]  ;;  %v316_v30 = vld [vmem:[%s1358_s1 + $0x20] sm:$0xff] }
  0x3d   : > { %686 = vmatprep.subr.mxu0 %v879_v0  ;;  %716 = vmatpush3.msra.mxu1 %v403_v25  ;;  %v1117_v32 = vld [vmem:[%s1017_s28 + $0x50] sm:$0xff]  ;;  %v315_v33 = vld [vmem:[%s1358_s1 + $0x18] sm:$0xff]  ;;  %v1133_v38 = vld [vmem:[%s1017_s28 + $0x60] sm:$0xff]  ;;  %p813_p4 = pneg %p812_p13 }
  0x3e   : > { %687 = vmatpush3.msra.mxu0 %v324_v4  ;;  %v278_v18 = vadd.f32 %v277_v15, %v1065_v13  ;;  %717 = vmatprep.subr.mxu1 %v879_v0  ;;  %v1125_v35 = vld [vmem:[%s1017_s28 + $0x58] sm:$0xff]  ;;  %v314_v36 = vld [vmem:[%s1358_s1 + $0x10] sm:$0xff]  ;;  %v313_v39 = vld [vmem:[%s1358_s1 + $0x8] sm:$0xff] }
  0x3f   : > { %688 = vmatprep.subr.mxu0 %v879_v0  ;;  %v1141_v41 = vld [vmem:[%s1017_s28 + $0x68] sm:$0xff]  ;;  %v312_v42 = vld [vmem:[%s1358_s1] sm:$0xff]  ;;  %v1149_v44 = vld [vmem:[%s1017_s28 + $0x70] sm:$0xff] }
  0x40   : > { %689 = vmatpush3.msra.mxu0 %v323_v7  ;;  %v279_v21 = vadd.f32 %v278_v18, %v1073_v16  ;;  %v1154_v46 = vld [vmem:[%s1017_s28 + $0x78] sm:$0xff]  ;;  %v1158_v48 = vld [vmem:[%s1017_s28 + $0x80] sm:$0xff]  ;;  %v1162_v50 = vld [vmem:[%s1017_s28 + $0x88] sm:$0xff] }
  0x41   : > { %690 = vmatprep.subr.mxu0 %v879_v0  ;;  %v1166_v52 = vld [vmem:[%s1017_s28 + $0x90] sm:$0xff]  ;;  %v1170_v54 = vld [vmem:[%s1017_s28 + $0x98] sm:$0xff]  ;;  %v1174_v56 = vld [vmem:[%s1017_s28 + $0xa0] sm:$0xff] }
  0x42   : > { %691 = vmatpush3.msra.mxu0 %v322_v11  ;;  %v280_v24 = vadd.f32 %v279_v21, %v1081_v19  ;;  %v1178_v58 = vld [vmem:[%s1017_s28 + $0xa8] sm:$0xff]  ;;  %v1182_v60 = vld [vmem:[%s1017_s28 + $0xb0] sm:$0xff]  ;;  %v1186_v62 = vld [vmem:[%s1017_s28 + $0xb8] sm:$0xff] }
  0x43   : > { %692 = vmatprep.subr.mxu0 %v879_v0  ;;  %v1190_v1 = vld [vmem:[%s1017_s28 + $0xc0] sm:$0xff]  ;;  %v1194_v3 = vld [vmem:[%s1017_s28 + $0xc8] sm:$0xff]  ;;  %v1198_v7 = vld [vmem:[%s1017_s28 + $0xd0] sm:$0xff] }
  0x44   : > { %693 = vmatpush3.msra.mxu0 %v321_v14  ;;  %v281_v28 = vadd.f32 %v280_v24, %v1089_v22  ;;  %v1202_v11 = vld [vmem:[%s1017_s28 + $0xd8] sm:$0xff]  ;;  %v1206_v14 = vld [vmem:[%s1017_s28 + $0xe0] sm:$0xff] }
  0x45   : > { %694 = vmatprep.subr.mxu0 %v879_v0 }
  0x46   : > { %695 = vmatpush3.msra.mxu0 %v320_v17  ;;  %v282_v31 = vadd.f32 %v281_v28, %v1100_v26  ;;  %v1210_v17 = vld [vmem:[%s1017_s28 + $0xe8] sm:$0xff] }
  0x47   : > { %696 = vmatprep.subr.mxu0 %v879_v0 }
  0x48   : > { %697 = vmatpush3.msra.mxu0 %v319_v20  ;;  %v283_v34 = vadd.f32 %v282_v31, %v1109_v29  ;;  %v1214_v20 = vld [vmem:[%s1017_s28 + $0xf0] sm:$0xff] }
  0x49   : > { %698 = vmatprep.subr.mxu0 %v879_v0 }
  0x4a   : > { %699 = vmatpush3.msra.mxu0 %v318_v23  ;;  %v284_v37 = vadd.f32 %v283_v34, %v1117_v32  ;;  %v1218_v23 = vld [vmem:[%s1017_s28 + $0xf8] sm:$0xff]  ;;  %s881_s28 = smov [#allocation5]  }
  0x4b   : > { %700 = vmatprep.subr.mxu0 %v879_v0  ;;  %s814_s13 = sshll.u32 %s881_s28, 4  ;;  %s815_s13 = int_to_ptr.vmem [resolvable:$false] %s814_s13 }
  0x4c   : > { %701 = vmatpush3.msra.mxu0 %v317_v27  ;;  %v285_v40 = vadd.f32 %v284_v37, %v1125_v35  ;;  %v401_v37 = vld [vmem:[%s1360_s3 + $0x8] sm:$0xff]  ;;  %s816_s17 = scalar_lea.vmem %s815_s13, 8192  ;;  %p817_p5 = scmp.lt.s32.totalorder %s1298_s8, %s815_s13 }
  0x4d   : > { %702 = vmatprep.subr.mxu0 %v879_v0  ;;  %p818_p7 = scmp.lt.s32.totalorder %s816_s17, %s810_s11 }
  0x4e   : > { %703 = vmatpush3.msra.mxu0 %v316_v30  ;;  %v286_v43 = vadd.f32 %v285_v40, %v1133_v38  ;;  %v328_v40 = vld [vmem:[%s1359_s2] sm:$0x1] }
  0x4f   : > { %704 = vmatprep.subr.mxu0 %v879_v0  ;;  %p819_p8 = por %p818_p7, %p817_p5 }
  0x50   : > { %705 = vmatpush3.msra.mxu0 %v315_v33  ;;  %v287_v45 = vadd.f32 %v286_v43, %v1141_v41 }
  0x51   : > { %706 = vmatprep.subr.mxu0 %v879_v0  ;;  %p820_p10 = pnand %p819_p8, %p813_p4 }
  0x52   : > { %707 = vmatpush3.msra.mxu0 %v314_v36  ;;  %v288_v47 = vadd.f32 %v287_v45, %v1149_v44  ;;  %v402_v36 = vld [vmem:[%s1360_s3 + $0x10] sm:$0xff] }
  0x53   : > { %708 = vmatprep.subr.mxu0 %v879_v0  ;;  %718 = vmatpush3.msra.mxu1 %v402_v36 }
  0x54   : > { %709 = vmatpush3.msra.mxu0 %v313_v39  ;;  %v289_v49 = vadd.f32 %v288_v47, %v1154_v46  ;;  %719 = vmatprep.subr.mxu1 %v879_v0  ;;  %v400_v39 = vld [vmem:[%s1360_s3] sm:$0xff] }
  0x55   : > { %710 = vmatprep.subr.mxu0 %v879_v0  ;;  %720 = vmatpush3.msra.mxu1 %v401_v37 }
  0x56   : > { %711 = vmatpush3.msra.mxu0 %v312_v42  ;;  %v290_v51 = vadd.f32 %v289_v49, %v1158_v48  ;;  %721 = vmatprep.subr.mxu1 %v879_v0  ;;  %v404_v49 = vld [vmem:[%s1361_s4] sm:$0x1] }
  0x57   : > { %722 = vmatpush3.msra.mxu1 %v400_v39 }
  0x58   : > { %v291_v53 = vadd.f32 %v290_v51, %v1162_v50 }
  0x5a   : > { %v292_v55 = vadd.f32 %v291_v53, %v1166_v52 }
  0x5c   : > { %v293_v57 = vadd.f32 %v292_v55, %v1170_v54 }
  0x5e   : > { %v294_v59 = vadd.f32 %v293_v57, %v1174_v56 }
  0x60   : > { %v295_v61 = vadd.f32 %v294_v59, %v1178_v58 }
  0x62   : > { %v296_v63 = vadd.f32 %v295_v61, %v1182_v60  ;;  %v485_v61 = vlaneseq }
  0x64   : > { %v297_v2 = vadd.f32 %v296_v63, %v1186_v62  ;;  %v486_v63 = vshrl.u32 %v485_v61, 7 }
  0x66   : > { %v298_v4 = vadd.f32 %v297_v2, %v1190_v1  ;;  %v487_v2 = vsub.s32 0, %v486_v63 }
  0x68   : > { %v299_v9 = vadd.f32 %v298_v4, %v1194_v3 }
  0x6a   : > { %v300_v12 = vadd.f32 %v299_v9, %v1198_v7 }
  0x6c   : > { %v301_v15 = vadd.f32 %v300_v12, %v1202_v11 }
  0x6e   : > { %v302_v18 = vadd.f32 %v301_v15, %v1206_v14 }
  0x70   : > { %v303_v21 = vadd.f32 %v302_v18, %v1210_v17 }
  0x72   : > { %v304_v24 = vadd.f32 %v303_v21, %v1214_v20 }
  0x74   : > { %v305_v25 = vadd.f32 %v304_v24, %v1218_v23 }
  0x76   : > { %v306_v27 = vrot.slane %v305_v25, 4 }
  0x78   : > { %v307_v28 = vadd.f32 %v306_v27, %v305_v25 }
  0x7a   : > { %v308_v30 = vrot.slane %v307_v28, 2 }
  0x7c   : > { %v309_v31 = vadd.f32 %v308_v30, %v307_v28 }
  0x7e   : > { %v310_v33 = vrot.slane %v309_v31, 1 }
  0x80   : > { %v311_v34 = vadd.f32 %v310_v33, %v309_v31 }
  0x82   : > { %713 = vmatmul.mubr.f32.vlgmr.msra.gmra.mxu0 %v311_v34 }
 0x142   : > { %v395_v42 = vpop.f32.mrf.mxu0 }
 0x143   : > { %v396_v43 = vadd.f32 %v395_v42, %v328_v40 }
 0x144   : > { %v714_v45 = vpop.f32.mrf.mxu0 }
 0x145   : > { %v399_v47 = vmax.f32 %v396_v43, 0.0 }
 0x147   : > { %724 = vmatmul.mubr.msk.f32.vlgmr.msra.gmra.mxu1 %vm405_vm1, %v399_v47 }
 0x207   : > { %v475_v0 = vpop.f32.mrf.mxu1 }
 0x208   : > { %v476_v51 = vadd.f32 %v475_v0, %v404_v49 }
 0x209   : > { %v725_v53 = vpop.f32.mrf.mxu1 }
 0x20a   : > { %v650_v55 = vmul.f32 -1.442695, %v476_v51 }
 0x20c   : > { %778 = vpow2.f32 %v650_v55 }
 0x219   : > { %v779_v57 = vpop.eup %778 }
 0x21a   : > { %v482_v59 = vadd.f32 1.0, %v779_v57 }
 0x21c   : > { %780 = vrcp.f32 %v482_v59 }
 0x229   : > { %v781_v4 = vpop.eup %780 }
 0x22a   : > { %v488_v9 = vrot.slane %v781_v4, %v487_v2 }
 0x22c   : > { %v489_v12 = vmul.f32 %v488_v9, %v1042_v5  ;;  %v490_v15 = vmul.f32 %v488_v9, %v1045_v6  ;;  %v491_v18 = vmul.f32 %v488_v9, %v1052_v8  ;;  %v492_v21 = vmul.f32 %v488_v9, %v1057_v10 }
 0x22d   : > { %v493_v24 = vmul.f32 %v488_v9, %v1065_v13  ;;  %v494_v25 = vmul.f32 %v488_v9, %v1073_v16  ;;  %v495_v27 = vmul.f32 %v488_v9, %v1081_v19  ;;  %v496_v28 = vmul.f32 %v488_v9, %v1089_v22 }
 0x22e   : > { %v497_v30 = vmul.f32 %v488_v9, %v1100_v26  ;;  %v498_v31 = vmul.f32 %v488_v9, %v1109_v29  ;;  %v499_v5 = vmul.f32 %v488_v9, %v1117_v32  ;;  %v500_v6 = vmul.f32 %v488_v9, %v1125_v35  ;;  %521 = vst [vmem:[%s1253_s16] sm:$0xff] %v489_v12 }
 0x22f   : > { %522 = vst [vmem:[%s1253_s16 + $0x8] sm:$0xff] %v490_v15  ;;  %523 = vst [vmem:[%s1253_s16 + $0x10] sm:$0xff] %v491_v18  ;;  %v501_v8 = vmul.f32 %v488_v9, %v1133_v38  ;;  %v502_v10 = vmul.f32 %v488_v9, %v1141_v41  ;;  %v503_v13 = vmul.f32 %v488_v9, %v1149_v44 }
 0x230   : > { %524 = vst [vmem:[%s1253_s16 + $0x18] sm:$0xff] %v492_v21  ;;  %v504_v16 = vmul.f32 %v488_v9, %v1154_v46  ;;  %525 = vst [vmem:[%s1253_s16 + $0x20] sm:$0xff] %v493_v24  ;;  %v505_v19 = vmul.f32 %v488_v9, %v1158_v48  ;;  %v506_v22 = vmul.f32 %v488_v9, %v1162_v50 }
 0x231   : > { %526 = vst [vmem:[%s1253_s16 + $0x28] sm:$0xff] %v494_v25  ;;  %527 = vst [vmem:[%s1253_s16 + $0x30] sm:$0xff] %v495_v27  ;;  %v507_v26 = vmul.f32 %v488_v9, %v1166_v52  ;;  %v508_v29 = vmul.f32 %v488_v9, %v1170_v54  ;;  %v509_v32 = vmul.f32 %v488_v9, %v1174_v56 }
 0x232   : > { %528 = vst [vmem:[%s1253_s16 + $0x38] sm:$0xff] %v496_v28  ;;  %529 = vst [vmem:[%s1253_s16 + $0x40] sm:$0xff] %v497_v30  ;;  %v510_v35 = vmul.f32 %v488_v9, %v1178_v58  ;;  %v511_v38 = vmul.f32 %v488_v9, %v1182_v60  ;;  %v512_v41 = vmul.f32 %v488_v9, %v1186_v62 }
 0x233   : > { %530 = vst [vmem:[%s1253_s16 + $0x48] sm:$0xff] %v498_v31  ;;  %531 = vst [vmem:[%s1253_s16 + $0x50] sm:$0xff] %v499_v5  ;;  %v513_v44 = vmul.f32 %v488_v9, %v1190_v1  ;;  %v514_v46 = vmul.f32 %v488_v9, %v1194_v3  ;;  %v515_v48 = vmul.f32 %v488_v9, %v1198_v7 }
 0x234   : > { %532 = vst [vmem:[%s1253_s16 + $0x58] sm:$0xff] %v500_v6  ;;  %533 = vst [vmem:[%s1253_s16 + $0x60] sm:$0xff] %v501_v8  ;;  %v516_v50 = vmul.f32 %v488_v9, %v1202_v11  ;;  %v517_v52 = vmul.f32 %v488_v9, %v1206_v14  ;;  %v518_v54 = vmul.f32 %v488_v9, %v1210_v17 }
 0x235   : > { %534 = vst [vmem:[%s1253_s16 + $0x68] sm:$0xff] %v502_v10  ;;  %535 = vst [vmem:[%s1253_s16 + $0x70] sm:$0xff] %v503_v13  ;;  %v519_v56 = vmul.f32 %v488_v9, %v1214_v20  ;;  %v520_v58 = vmul.f32 %v488_v9, %v1218_v23 }
 0x236   : > { %536 = vst [vmem:[%s1253_s16 + $0x78] sm:$0xff] %v504_v16  ;;  %537 = vst [vmem:[%s1253_s16 + $0x80] sm:$0xff] %v505_v19 }
 0x237   : > { %538 = vst [vmem:[%s1253_s16 + $0x88] sm:$0xff] %v506_v22  ;;  %539 = vst [vmem:[%s1253_s16 + $0x90] sm:$0xff] %v507_v26 }
 0x238   : > { %540 = vst [vmem:[%s1253_s16 + $0x98] sm:$0xff] %v508_v29  ;;  %541 = vst [vmem:[%s1253_s16 + $0xa0] sm:$0xff] %v509_v32 }
 0x239   : > { %542 = vst [vmem:[%s1253_s16 + $0xa8] sm:$0xff] %v510_v35  ;;  %543 = vst [vmem:[%s1253_s16 + $0xb0] sm:$0xff] %v511_v38 }
 0x23a   : > { %544 = vst [vmem:[%s1253_s16 + $0xb8] sm:$0xff] %v512_v41  ;;  %545 = vst [vmem:[%s1253_s16 + $0xc0] sm:$0xff] %v513_v44 }
 0x23b   : > { %546 = vst [vmem:[%s1253_s16 + $0xc8] sm:$0xff] %v514_v46  ;;  %547 = vst [vmem:[%s1253_s16 + $0xd0] sm:$0xff] %v515_v48 }
 0x23c   : > { %548 = vst [vmem:[%s1253_s16 + $0xd8] sm:$0xff] %v516_v50  ;;  %549 = vst [vmem:[%s1253_s16 + $0xe0] sm:$0xff] %v517_v52 }
 0x23d   : > { %550 = vst [vmem:[%s1253_s16 + $0xe8] sm:$0xff] %v518_v54  ;;  %551 = vst [vmem:[%s1253_s16 + $0xf0] sm:$0xff] %v519_v56 }
 0x23e   : > { %552 = vst [vmem:[%s1253_s16 + $0xf8] sm:$0xff] %v520_v58 }
 0x23f   : > { %823 = shalt.err (!%p820_p10)
}
 0x240   : > { %s824_s26 = scalar_lea.hbm %s1296_s9, 4096  ;;  %s828_s15 = scalar_lea.hbm %s1362_s5, 8192 }
 0x241   : > { %p825_p0 = scmp.ne.s32.totalorder %s1296_s9, %s824_s26  ;;  %p829_p1 = scmp.lt.s32.totalorder %s1296_s9, %s1362_s5 }
 0x242   : > { %p830_p3 = scmp.lt.s32.totalorder %s828_s15, %s824_s26 }
 0x243   : > { %p826_p2 = pnand %p825_p0, %p1371_p12 }
 0x244   : > { %p831_p6 = por %p830_p3, %p829_p1 }
 0x245   : > { %p827_p9 = pneg %p826_p2 }
 0x247   : > { %p832_p11 = pnand %p831_p6, %p827_p9 }
 0x249   : > { %835 = shalt.err (!%p832_p11)
}
 0x24a   : > { %s882_s25 = smov 128   ;;  %s883_s22 = smov 8  }
 0x24b   : > { %728 = dma.vmem_to_hbm [thread:$0]  (%p1371_p12), %s1298_s8, 4096, %s1296_s9, %s554_s10, %s882_s25, %s882_s25, %s883_s22  }
 0x24c PF: > { %s582_s7 = sand.u32 1, %s862_s18   ;;  %p1372_p13 = scmp.ne.s32.totalorder %s1368_s6, 0 }
 0x24d   : > { %p1373_p4 = scmp.ge.s32.totalorder %s874_s21, 2  ;;  %s583_s11 = scalar_lea.sflag [#allocation4], %s582_s7 }
 0x24f   : > { %p735_p5 = pnand %p1373_p4, %p1372_p13 }
 0x251   : > { %p736_p7 = pneg %p735_p5 }
 0x253   : > { %857 = dma.done.wait (%p736_p7), %s583_s11, 4096  }
 0x254   : > { %859 = vsyncadd (%p736_p7), %s583_s11, 4294963200  ;;  %p18_p8 = scmp.ge.s32.totalorder %s939_s24, 4   ;;  %s1374_s18 = smov %s866_s19 }
 0x255   : > { %s1375_s19 = smov %s870_s20  ;;  %s1376_s20 = smov %s951_s27 }
 0x256   : > { %s1377_s21 = smov %s939_s24  ;;  %20 = sbr.rel (!%p18_p8) target bundleno = 5 (0x5), region = 85 }
 0x25b   :  { %588 = vsyncpa [#allocation3], 1 }
 0x25c   :  { %590 = vsyncpa [#allocation3 + $0x1], 1 }
 0x25d   :  { %591 = vsyncpa [#allocation4], 1 }
 0x25e   :  { %593 = vsyncpa [#allocation4 + $0x1], 1 }

</bundles_post_ra>
